<compile_context>
chip_gen: v6e
topology: v6e:2x2x1
jax: 0.10.0
libtpu: 0.0.40
codegen_flags: <defaults>
</compile_context>

<pallas_src>
import jax
import jax.numpy as jnp
from jax.experimental import pallas as pl
from jax.experimental.pallas import tpu as pltpu


def _conv1x1_chain_kernel(x_ref, w_ref, b_ref, o_ref):
    # x_ref: (Cin, TM)  w_ref: (Cout, Cin)  b_ref: (Cout, 1)  o_ref: (Cout, TM)
    cout, cin = w_ref.shape
    w = w_ref[...]
    # VPU broadcast-FMA "matmul": out[co, :] = sum_ci w[co, ci] * x[ci, :] + b[co]
    acc = w[:, 0:1] * x_ref[0:1, :]                      # (Cout,1)*(1,TM) -> (Cout,TM)
    for ci in range(1, cin):
        acc = acc + w[:, ci:ci + 1] * x_ref[ci:ci + 1, :]
    t1 = acc + b_ref[...]                                # bias broadcast over lanes
    # Exact simplification of the original chain:
    #   clip(t1 + 3*(t1 - |t1|), 0, 6) == clip(t1, 0, 6)
    t5 = jnp.clip(t1, 0.0, 6.0)
    o_ref[...] = (t1 - 4.0 * t5).astype(o_ref.dtype)


def _choose_tile(m, n_batch):
    """Lane tile (multiple of 128). Large tiles to amortize per-step overhead,
    capped at 65536 lanes so double-buffered blocks fit every generation's
    default scoped VMEM. Keep >= 2 total grid steps when batch == 1 (v7x)."""
    tm = ((m + 127) // 128) * 128
    tm = min(tm, 65536)
    if n_batch == 1 and tm >= m and m > 128:
        # split M into at least two lane tiles so both v7x TCs get work
        half = (((m + 1) // 2) + 127) // 128 * 128
        tm = max(128, half)
    return tm


def model_forward(x_nchw, weight, bias):
    """x_nchw: (N, Cin, H, W); weight: (Cout, Cin, 1, 1); bias: (Cout,)"""
    N, Cin, H, W = x_nchw.shape
    Cout = weight.shape[0]
    M = H * W

    # Free reshape: NCHW -> (N, Cin, M); no transpose, no pad, no slice.
    x_r = x_nchw.reshape(N, Cin, M).astype(jnp.float32)
    w_mat = weight.reshape(Cout, Cin).astype(jnp.float32)   # (Cout, Cin)
    b_col = bias.reshape(Cout, 1).astype(jnp.float32)       # (Cout, 1)

    tm = _choose_tile(M, N)
    n_tiles = pl.cdiv(M, tm)

    out_r = pl.pallas_call(
        _conv1x1_chain_kernel,
        out_shape=jax.ShapeDtypeStruct((N, Cout, M), jnp.float32),
        grid=(N, n_tiles),
        in_specs=[
            # batch dim squeezed; activations lane-tiled along M
            pl.BlockSpec((None, Cin, tm), lambda n, i: (n, 0, i)),
            pl.BlockSpec((Cout, Cin), lambda n, i: (0, 0)),   # weights (whole)
            pl.BlockSpec((Cout, 1), lambda n, i: (0, 0)),     # bias (whole)
        ],
        out_specs=pl.BlockSpec((None, Cout, tm), lambda n, i: (n, 0, i)),
        compiler_params=pltpu.CompilerParams(
            dimension_semantics=("parallel", "parallel")),
    )(x_r, w_mat, b_col)

    inner = out_r.reshape(N, Cout, H, W)

    # Border pixels saw zero input: t1 = bias -> out = bias - 4*clip(bias,0,6).
    b_f32 = bias.astype(jnp.float32)
    border = b_f32 - 4.0 * jnp.clip(b_f32, 0.0, 6.0)          # (Cout,)
    Hp, Wp = H + 2, W + 2
    padded = jnp.pad(inner, ((0, 0), (0, 0), (1, 1), (1, 1)))
    row_in = (jnp.arange(Hp) >= 1) & (jnp.arange(Hp) <= H)
    col_in = (jnp.arange(Wp) >= 1) & (jnp.arange(Wp) <= W)
    interior = row_in[:, None] & col_in[None, :]
    # pad + where fuse into a single output pass in XLA; interior stays exact.
    out = jnp.where(interior[None, None, :, :], padded,
                    border[None, :, None, None])
    return out


def _reference(x_nchw, weight, bias):
    # Pure-JAX reference of the ORIGINAL (unsimplified) PyTorch forward.
    xp = jnp.pad(x_nchw, ((0, 0), (0, 0), (1, 1), (1, 1)))
    t1 = jnp.einsum("nchw,oc->nohw", xp, weight.reshape(weight.shape[0], -1)) \
         + bias[None, :, None, None]
    t2 = jnp.abs(t1)
    t3 = t1 - t2
    t4 = t1 + 3.0 * t3
    t5 = jnp.clip(t4, 0.0, 6.0)
    t6 = 4.0 * t5
    return t1 - t6


if __name__ == "__main__":
    key = jax.random.PRNGKey(0)
    kx, kw, kb = jax.random.split(key, 3)

    # Shapes consistent with the module spec: Conv2d(3, 8, 1, padding=1), x (1,3,64,64).
    N, Cin, H, W, Cout = 1, 3, 64, 64, 8
    x1 = jax.random.normal(kx, (N, Cin, H, W), dtype=jnp.float32)
    weight = jax.random.normal(kw, (Cout, Cin, 1, 1), dtype=jnp.float32) * 0.1
    bias = jax.random.normal(kb, (Cout,), dtype=jnp.float32) * 0.1

    out = model_forward(x1, weight, bias)
    jax.block_until_ready(out)

    ref = _reference(x1, weight, bias)
    assert out.shape == (N, Cout, H + 2, W + 2), out.shape
    assert jnp.allclose(out, ref, atol=1e-5, rtol=1e-5)

    print("KERNEL_OK")
</pallas_src>

<mosaic_0001>
module attributes {stable_mosaic.version = 11 : i64} {
  func.func @_conv1x1_chain_kernel(%arg0: i32, %arg1: i32, %arg2: memref<1x3x2048xf32, #tpu.memory_space<vmem>>, %arg3: memref<8x3xf32, #tpu.memory_space<vmem>>, %arg4: memref<8x1xf32, #tpu.memory_space<vmem>>, %arg5: memref<1x8x2048xf32, #tpu.memory_space<vmem>>) attributes {dimension_semantics = [#tpu.dimension_semantics<parallel>, #tpu.dimension_semantics<parallel>], iteration_bounds = array<i64: 1, 2>, scalar_prefetch = 0 : i64, scratch_operands = 0 : i64, tpu.core_type = #tpu.core_type<tc>, window_params = [{transform_indices = @transform_0, window_bounds = array<i64: 1, 3, 2048>}, {pipeline_mode = #tpu.pipeline_mode<synchronous>, transform_indices = @transform_1, window_bounds = array<i64: 8, 3>}, {pipeline_mode = #tpu.pipeline_mode<synchronous>, transform_indices = @transform_2, window_bounds = array<i64: 8, 1>}, {transform_indices = @transform_3, window_bounds = array<i64: 1, 8, 2048>}]} {
    %c0 = arith.constant 0 : index
    %c0_0 = arith.constant 0 : index
    %0 = vector.load %arg3[%c0, %c0_0] : memref<8x3xf32, #tpu.memory_space<vmem>>, vector<8x3xf32>
    %1 = vector.extract_strided_slice %0 {offsets = [0, 0], sizes = [8, 1], strides = [1, 1]} : vector<8x3xf32> to vector<8x1xf32>
    %c0_1 = arith.constant 0 : index
    %c0_2 = arith.constant 0 : index
    %c0_3 = arith.constant 0 : index
    %2 = vector.load %arg2[%c0_1, %c0_2, %c0_3] : memref<1x3x2048xf32, #tpu.memory_space<vmem>>, vector<1x1x2048xf32>
    %3 = vector.shape_cast %2 : vector<1x1x2048xf32> to vector<1x2048xf32>
    %4 = vector.broadcast %1 : vector<8x1xf32> to vector<8x2048xf32>
    %5 = vector.broadcast %3 : vector<1x2048xf32> to vector<8x2048xf32>
    %6 = arith.mulf %4, %5 : vector<8x2048xf32>
    %7 = vector.extract_strided_slice %0 {offsets = [0, 1], sizes = [8, 1], strides = [1, 1]} : vector<8x3xf32> to vector<8x1xf32>
    %c0_4 = arith.constant 0 : index
    %c1 = arith.constant 1 : index
    %c0_5 = arith.constant 0 : index
    %8 = vector.load %arg2[%c0_4, %c1, %c0_5] : memref<1x3x2048xf32, #tpu.memory_space<vmem>>, vector<1x1x2048xf32>
    %9 = vector.shape_cast %8 : vector<1x1x2048xf32> to vector<1x2048xf32>
    %10 = vector.broadcast %7 : vector<8x1xf32> to vector<8x2048xf32>
    %11 = vector.broadcast %9 : vector<1x2048xf32> to vector<8x2048xf32>
    %12 = arith.mulf %10, %11 : vector<8x2048xf32>
    %13 = arith.addf %6, %12 : vector<8x2048xf32>
    %14 = vector.extract_strided_slice %0 {offsets = [0, 2], sizes = [8, 1], strides = [1, 1]} : vector<8x3xf32> to vector<8x1xf32>
    %c0_6 = arith.constant 0 : index
    %c2 = arith.constant 2 : index
    %c0_7 = arith.constant 0 : index
    %15 = vector.load %arg2[%c0_6, %c2, %c0_7] : memref<1x3x2048xf32, #tpu.memory_space<vmem>>, vector<1x1x2048xf32>
    %16 = vector.shape_cast %15 : vector<1x1x2048xf32> to vector<1x2048xf32>
    %17 = vector.broadcast %14 : vector<8x1xf32> to vector<8x2048xf32>
    %18 = vector.broadcast %16 : vector<1x2048xf32> to vector<8x2048xf32>
    %19 = arith.mulf %17, %18 : vector<8x2048xf32>
    %20 = arith.addf %13, %19 : vector<8x2048xf32>
    %c0_8 = arith.constant 0 : index
    %c0_9 = arith.constant 0 : index
    %21 = vector.load %arg4[%c0_8, %c0_9] : memref<8x1xf32, #tpu.memory_space<vmem>>, vector<8x1xf32>
    %22 = vector.broadcast %21 : vector<8x1xf32> to vector<8x2048xf32>
    %23 = arith.addf %20, %22 : vector<8x2048xf32>
    %cst = arith.constant 0.000000e+00 : f32
    %cst_10 = arith.constant 6.000000e+00 : f32
    %24 = vector.broadcast %cst : f32 to vector<8x2048xf32>
    %25 = arith.maximumf %24, %23 : vector<8x2048xf32>
    %26 = vector.broadcast %cst_10 : f32 to vector<8x2048xf32>
    %27 = arith.minimumf %26, %25 : vector<8x2048xf32>
    %cst_11 = arith.constant 4.000000e+00 : f32
    %28 = vector.broadcast %cst_11 : f32 to vector<8x2048xf32>
    %29 = arith.mulf %28, %27 : vector<8x2048xf32>
    %30 = arith.subf %23, %29 : vector<8x2048xf32>
    %c0_12 = arith.constant 0 : index
    %c0_13 = arith.constant 0 : index
    %c0_14 = arith.constant 0 : index
    %31 = vector.load %arg5[%c0_12, %c0_13, %c0_14] : memref<1x8x2048xf32, #tpu.memory_space<vmem>>, vector<1x8x2048xf32>
    %32 = vector.shape_cast %31 : vector<1x8x2048xf32> to vector<8x2048xf32>
    %33 = vector.shape_cast %30 : vector<8x2048xf32> to vector<1x8x2048xf32>
    tpu.vector_store %arg5[%c0_12, %c0_13, %c0_14], %33 {strides = array<i32>} : memref<1x8x2048xf32, #tpu.memory_space<vmem>>, vector<1x8x2048xf32>,
    return
  }
  func.func @transform_0(%arg0: i32, %arg1: i32) -> (i32, i32, i32) {
    %c0_i32 = arith.constant 0 : i32
    %c0_i32_0 = arith.constant 0 : i32
    return %arg0, %c0_i32, %arg1 : i32, i32, i32
  }
  func.func @transform_1(%arg0: i32, %arg1: i32) -> (i32, i32) {
    %c0_i32 = arith.constant 0 : i32
    %c0_i32_0 = arith.constant 0 : i32
    %c0_i32_1 = arith.constant 0 : i32
    return %c0_i32, %c0_i32_0 : i32, i32
  }
  func.func @transform_2(%arg0: i32, %arg1: i32) -> (i32, i32) {
    %c0_i32 = arith.constant 0 : i32
    %c0_i32_0 = arith.constant 0 : i32
    %c0_i32_1 = arith.constant 0 : i32
    return %c0_i32, %c0_i32_0 : i32, i32
  }
  func.func @transform_3(%arg0: i32, %arg1: i32) -> (i32, i32, i32) {
    %c0_i32 = arith.constant 0 : i32
    %c0_i32_0 = arith.constant 0 : i32
    return %arg0, %c0_i32, %arg1 : i32, i32, i32
  }
}

</mosaic_0001>

<bundles_post_ra>
// kernel: tpu_custom_call.1
= control target key start
LH: loop header
LB: loop body
LE: loop exit
PB: predicated region body
PF: predicated region fallthrough
CT: control target
= control target key end

     0   :  { %8 = vsyncpa [#allocation3], 0  ;;  %s1304_s0 = inlined_call_operand.vmem [shape: f32[1,3,4096], index: 0, kind: input, shape index: {}]   ;;  %s1305_s1 = inlined_call_operand.vmem [shape: f32[8,3], index: 1, kind: input, shape index: {}]   ;;  %s1306_s2 = inlined_call_operand.vmem [shape: f32[8,1], index: 2, kind: input, shape index: {}]   ;;  %s1307_s3 = inlined_call_operand.hbm [shape: f32[1,8,4096], index: 3, kind: output, shape index: {}]  }
   0x1   :  { %10 = vsyncpa [#allocation3 + $0x1], 0  ;;  %s930_s12 = smov 0   ;;  %s932_s13 = smov 0  }
   0x2   :  { %s934_s14 = smov 0   ;;  %s936_s15 = smov 0  }
   0x3   :  { %s938_s16 = smov 0   ;;  %s940_s17 = smov 0  }
   0x4 LB: > { %s746_s18 = sadd.s32 4294967295, %s904_s17   ;;  %s747_s19 = sadd.s32 4294967294, %s904_s17   ;;  %s904_s17 = sphi %s940_s17, %s16_s17   ;;  %s900_s16 = sphi %s938_s16, %s1338_s16   ;;  %s896_s15 = sphi %s936_s15, %s1337_s15   ;;  %s892_s14 = sphi %s934_s14, %s1336_s14   ;;  %s888_s13 = sphi %s932_s13, %s1335_s13   ;;  %s884_s12 = sphi %s930_s12, %s1334_s12  }
   0x5   : > { %s25_s20 = sadd.s32 1, %s900_s16  ;;  %s107_s21 = sadd.s32 1, %s892_s14 }
   0x6   : > { %p26_p0 = scmp.ge.s32.totalorder %s25_s20, 2  ;;  %p117_p1 = scmp.ne.s32.totalorder %s892_s14, %s888_s13 }
   0x7   : > { %p118_p2 = scmp.eq.s32.totalorder %s746_s18, 1  ;;  %p123_p3 = scmp.ne.s32.totalorder %s888_s13, %s884_s12 }
   0x8   : > { %s1340_s20 = smov (%p26_p0, %s25_s20), 0  ;;  %p124_p5 = scmp.eq.s32.totalorder %s747_s19, 1 }
   0x9   : > { %p970_p4 = por %p118_p2, %p117_p1  ;;  %s103_s23 = ssub.s32 %s900_s16, %s1340_s20 }
   0xa   : > { %p750_p6 = scmp.ge.s32.totalorder %s904_s17, 1  ;;  %p105_p7 = scmp.eq.s32.totalorder %s103_s23, 0 }
   0xb   : > { %p977_p8 = por %p124_p5, %p123_p3  ;;  %p161_p9 = scmp.lt.s32.totalorder %s904_s17, 3 }
   0xc   : > { %s983_s25 = scalar_select %p105_p7, %s892_s14, %s107_s21  }
   0xd   : > { %p162_p10 = pnand %p750_p6, %p161_p9 }
   0xf   : > { %165 = sbr.rel (%p162_p10) target bundleno = 208 (0xd0), region = 32 }
  0x14   : > { %v200_v0 = vld [vmem:[%s1305_s1] sm:$0xff]  ;;  %v906_v1 = vmov 0   ;;  %v907_v2 = vmov 2   ;;  %v908_v4 = vmov 1   ;;  %s752_s30 = sshll.u32 %s896_s15, 4  ;;  %v211_v5 = vlaneseq  ;;  %s186_s8 = sand.u32 1, %s888_s13  }
  0x15   : > { %823 = vset.pattern.permute.xlu0 %v906_v1  ;;  %825 = vset.pattern.permute.xlu1 %v907_v2  ;;  %v551_v3 = vld [vmem:[%s1306_s2] sm:$0xff]  ;;  %p192_p11 = scmp.lt.s32.totalorder %s752_s30, 31  ;;  %s1214_s9 = sshll.u32 %s186_s8, 7 }
  0x16   : > { %206 = vperm.xlu0 %823, %v200_v0   ;;  %434 = vperm.xlu1 %825, %v200_v0   ;;  %v212_v6 = vshrl.u32 %v211_v5, 7  ;;  %s764_s10 = sshll.u32 %s896_s15, 11  ;;  %s1222_s11 = scalar_lea.vmem [#allocation2], %s1214_s9 }
  0x17   : > { %s1342_s30 = smov (!%p192_p11, %s752_s30), 31  ;;  %s670_s18 = sshll.u32 %s1222_s11, 4  ;;  %s1250_s18 = int_to_ptr.vmem [resolvable:$true] %s670_s18 }
  0x18   : > { %s753_s4 = sshll.u32 %s1342_s30, 2  ;;  %v997_v7 = vsub.s32 0, %v212_v6  ;;  %v999_v8 = vsub.s32 1, %v212_v6  ;;  %v1001_v9 = vsub.s32 2, %v212_v6  ;;  %v1003_v10 = vsub.s32 3, %v212_v6  ;;  %s1248_s21 = scalar_lea.hbm %s1307_s3, %s764_s10 }
  0x19   : > { %s995_s7 = scalar_lea.vmem %s1304_s0, %s753_s4  ;;  %v1005_v11 = vsub.s32 4, %v212_v6  ;;  %v1007_v12 = vsub.s32 5, %v212_v6  ;;  %v1009_v13 = vsub.s32 6, %v212_v6  ;;  %v1011_v14 = vsub.s32 7, %v212_v6  ;;  %s654_s23 = scalar_lea.sflag [#allocation3], %s186_s8 }
  0x1a   : > { %824 = vset.pattern.permute.xlu0 %v908_v4  ;;  %826 = vset.pattern.permute.xlu1 %v906_v1  ;;  %1314 = vst [vmem:[#allocation5_spill] sm:$0xff] %v997_v7  ;;  %1315 = vst [vmem:[#allocation6_spill] sm:$0xff] %v999_v8  ;;  %v1014_v15 = vld [vmem:[%s995_s7] ss:$4 sm:$0xff]  ;;  %v1036_v25 = vld [vmem:[%s995_s7 + $0x1] ss:$4 sm:$0xff] }
  0x1b   : > { %312 = vperm.xlu0 %824, %v200_v0   ;;  %554 = vperm.xlu1 %826, %v551_v3   ;;  %1316 = vst [vmem:[#allocation7_spill] sm:$0xff] %v1001_v9  ;;  %1317 = vst [vmem:[#allocation8_spill] sm:$0xff] %v1003_v10  ;;  %v1017_v16 = vld [vmem:[%s995_s7 + $0x20] ss:$4 sm:$0xff]  ;;  %v214_v17 = vrot.slane %v1014_v15, %v997_v7  ;;  %v218_v18 = vrot.slane %v1014_v15, %v999_v8  ;;  %v1055_v34 = vld [vmem:[%s995_s7 + $0x21] ss:$4 sm:$0xff] }
  0x1c   : > { %v222_v19 = vrot.slane %v1014_v15, %v1001_v9  ;;  %v226_v20 = vrot.slane %v1014_v15, %v1003_v10  ;;  %v230_v21 = vrot.slane %v1014_v15, %v1005_v11  ;;  %v234_v22 = vrot.slane %v1014_v15, %v1007_v12  ;;  %v1074_v43 = vld [vmem:[%s995_s7 + $0x2] ss:$4 sm:$0xff]  ;;  %s828_s26 = scalar_lea.vmem %s1250_s18, 2048  ;;  %s909_s27 = smov [#allocation2]  }
  0x1d   : > { %v238_v23 = vrot.slane %v1014_v15, %v1009_v13  ;;  %v242_v24 = vrot.slane %v1014_v15, %v1011_v14  ;;  %v246_v26 = vrot.slane %v1017_v16, %v997_v7  ;;  %v250_v27 = vrot.slane %v1017_v16, %v999_v8  ;;  %v1093_v52 = vld [vmem:[%s995_s7 + $0x22] ss:$4 sm:$0xff]  ;;  %p829_p12 = scmp.ne.s32.totalorder %s1250_s18, %s828_s26  ;;  %s832_s28 = sshll.u32 %s909_s27, 4  ;;  %s833_s28 = int_to_ptr.vmem [resolvable:$false] %s832_s28 }
  0x1e   : > { %v254_v28 = vrot.slane %v1017_v16, %v1001_v9  ;;  %v258_v29 = vrot.slane %v1017_v16, %v1003_v10  ;;  %v262_v30 = vrot.slane %v1017_v16, %v1005_v11  ;;  %v266_v31 = vrot.slane %v1017_v16, %v1007_v12  ;;  %s834_s29 = scalar_lea.vmem %s833_s28, 4096  ;;  %p835_p1 = scmp.lt.s32.totalorder %s1250_s18, %s833_s28 }
  0x1f   : > { %827 = vset.pattern.permute.xlu0 %v906_v1  ;;  %v270_v32 = vrot.slane %v1017_v16, %v1009_v13  ;;  %v274_v33 = vrot.slane %v1017_v16, %v1011_v14  ;;  %v320_v35 = vrot.slane %v1036_v25, %v997_v7  ;;  %v324_v36 = vrot.slane %v1036_v25, %v999_v8  ;;  %p830_p13 = pnand %p829_p12, %p970_p4  ;;  %p836_p2 = scmp.lt.s32.totalorder %s834_s29, %s828_s26 }
  0x20   : > { %v328_v37 = vrot.slane %v1036_v25, %v1001_v9  ;;  %v332_v38 = vrot.slane %v1036_v25, %v1003_v10  ;;  %v336_v39 = vrot.slane %v1036_v25, %v1005_v11  ;;  %v340_v40 = vrot.slane %v1036_v25, %v1007_v12 }
  0x21   : > { %v344_v41 = vrot.slane %v1036_v25, %v1009_v13  ;;  %v348_v42 = vrot.slane %v1036_v25, %v1011_v14  ;;  %v352_v44 = vrot.slane %v1055_v34, %v997_v7  ;;  %v356_v45 = vrot.slane %v1055_v34, %v999_v8  ;;  %p831_p0 = pneg %p830_p13  ;;  %p837_p3 = por %p836_p2, %p835_p1 }
  0x22   : > { %v360_v46 = vrot.slane %v1055_v34, %v1001_v9  ;;  %v364_v47 = vrot.slane %v1055_v34, %v1003_v10  ;;  %v368_v48 = vrot.slane %v1055_v34, %v1005_v11  ;;  %v372_v49 = vrot.slane %v1055_v34, %v1007_v12 }
  0x23   : > { %v376_v50 = vrot.slane %v1055_v34, %v1009_v13  ;;  %v380_v51 = vrot.slane %v1055_v34, %v1011_v14  ;;  %v442_v53 = vrot.slane %v1074_v43, %v997_v7  ;;  %v446_v54 = vrot.slane %v1074_v43, %v999_v8  ;;  %p838_p5 = pnand %p837_p3, %p831_p0 }
  0x24   : > { %v450_v55 = vrot.slane %v1074_v43, %v1001_v9  ;;  %v454_v56 = vrot.slane %v1074_v43, %v1003_v10 }
  0x91   : > { %v207_v1 = vpop.permute.xlu0 %206  ;;  %v435_v61 = vpop.permute.xlu1 %434 }
  0x92   : > { %v291_v6 = vmul.f32 %v214_v17, %v207_v1  ;;  %v292_v15 = vmul.f32 %v218_v18, %v207_v1  ;;  %v293_v16 = vmul.f32 %v222_v19, %v207_v1  ;;  %v294_v25 = vmul.f32 %v226_v20, %v207_v1 }
  0x93   : > { %v295_v34 = vmul.f32 %v230_v21, %v207_v1  ;;  %v296_v63 = vmul.f32 %v234_v22, %v207_v1  ;;  %v297_v0 = vmul.f32 %v238_v23, %v207_v1  ;;  %v298_v62 = vmul.f32 %v242_v24, %v207_v1 }
  0x94   : > { %v299_v60 = vmul.f32 %v246_v26, %v207_v1  ;;  %v300_v2 = vmul.f32 %v250_v27, %v207_v1  ;;  %v301_v59 = vmul.f32 %v254_v28, %v207_v1  ;;  %v302_v58 = vmul.f32 %v258_v29, %v207_v1 }
  0x95   : > { %v303_v3 = vmul.f32 %v262_v30, %v207_v1  ;;  %v304_v57 = vmul.f32 %v266_v31, %v207_v1  ;;  %v305_v10 = vmul.f32 %v270_v32, %v207_v1  ;;  %v306_v4 = vmul.f32 %v274_v33, %v207_v1 }
  0x96   : > { %v313_v9 = vpop.permute.xlu0 %312  ;;  %v519_v8 = vmul.f32 %v442_v53, %v435_v61  ;;  %v520_v5 = vmul.f32 %v446_v54, %v435_v61  ;;  %v521_v17 = vmul.f32 %v450_v55, %v435_v61  ;;  %v522_v18 = vmul.f32 %v454_v56, %v435_v61 }
  0x97   : > { %v397_v19 = vmul.f32 %v320_v35, %v313_v9  ;;  %v398_v20 = vmul.f32 %v324_v36, %v313_v9  ;;  %v399_v21 = vmul.f32 %v328_v37, %v313_v9  ;;  %v400_v22 = vmul.f32 %v332_v38, %v313_v9 }
  0x98   : > { %v401_v23 = vmul.f32 %v336_v39, %v313_v9  ;;  %v402_v24 = vmul.f32 %v340_v40, %v313_v9  ;;  %v403_v7 = vmul.f32 %v344_v41, %v313_v9  ;;  %v404_v26 = vmul.f32 %v348_v42, %v313_v9 }
  0x99   : > { %v405_v27 = vmul.f32 %v352_v44, %v313_v9  ;;  %v406_v28 = vmul.f32 %v356_v45, %v313_v9  ;;  %v407_v29 = vmul.f32 %v360_v46, %v313_v9  ;;  %v408_v30 = vmul.f32 %v364_v47, %v313_v9 }
  0x9a   : > { %v409_v31 = vmul.f32 %v368_v48, %v313_v9  ;;  %v410_v32 = vmul.f32 %v372_v49, %v313_v9  ;;  %v411_v33 = vmul.f32 %v376_v50, %v313_v9  ;;  %v412_v1 = vmul.f32 %v380_v51, %v313_v9 }
  0x9b   : > { %v413_v53 = vadd.f32 %v397_v19, %v291_v6  ;;  %v414_v54 = vadd.f32 %v398_v20, %v292_v15  ;;  %v415_v55 = vadd.f32 %v399_v21, %v293_v16  ;;  %v416_v56 = vadd.f32 %v400_v22, %v294_v25  ;;  %v1328_v6 = vld [vmem:[#allocation8_spill] sm:$0xff] }
  0x9c   : > { %v417_v35 = vadd.f32 %v401_v23, %v295_v34  ;;  %v418_v36 = vadd.f32 %v402_v24, %v296_v63  ;;  %v419_v37 = vadd.f32 %v403_v7, %v297_v0  ;;  %v420_v38 = vadd.f32 %v404_v26, %v298_v62  ;;  %v1324_v62 = vld [vmem:[#allocation6_spill] sm:$0xff] }
  0x9d   : > { %v421_v39 = vadd.f32 %v405_v27, %v299_v60  ;;  %v422_v40 = vadd.f32 %v406_v28, %v300_v2  ;;  %v423_v41 = vadd.f32 %v407_v29, %v301_v59  ;;  %v424_v42 = vadd.f32 %v408_v30, %v302_v58  ;;  %v1326_v2 = vld [vmem:[#allocation7_spill] sm:$0xff]  ;;  %v555_v29 = vpop.permute.xlu1 %554 }
  0x9e   : > { %v425_v44 = vadd.f32 %v409_v31, %v303_v3  ;;  %v426_v45 = vadd.f32 %v410_v32, %v304_v57  ;;  %v427_v46 = vadd.f32 %v411_v33, %v305_v10  ;;  %v428_v47 = vadd.f32 %v412_v1, %v306_v4  ;;  %v1322_v57 = vld [vmem:[#allocation5_spill] sm:$0xff] }
  0x9f   : > { %v1318_v48 = vrot.slane %v1074_v43, %v1005_v11  ;;  %v1319_v49 = vrot.slane %v1074_v43, %v1007_v12  ;;  %v1320_v7 = vrot.slane %v1074_v43, %v1009_v13  ;;  %v1321_v59 = vrot.slane %v1074_v43, %v1011_v14 }
  0xa0   : > { %v1323_v10 = vrot.slane %v1093_v52, %v1322_v57  ;;  %v1325_v63 = vrot.slane %v1093_v52, %v1324_v62  ;;  %v1327_v3 = vrot.slane %v1093_v52, %v1326_v2  ;;  %v1329_v15 = vrot.slane %v1093_v52, %v1328_v6 }
  0xa1   : > { %v523_v9 = vmul.f32 %v1318_v48, %v435_v61  ;;  %v524_v50 = vmul.f32 %v1319_v49, %v435_v61  ;;  %v525_v51 = vmul.f32 %v1320_v7, %v435_v61  ;;  %v526_v58 = vmul.f32 %v1321_v59, %v435_v61 }
  0xa2   : > { %v527_v60 = vmul.f32 %v1323_v10, %v435_v61  ;;  %v528_v0 = vmul.f32 %v1325_v63, %v435_v61  ;;  %v529_v4 = vmul.f32 %v1327_v3, %v435_v61  ;;  %v530_v16 = vmul.f32 %v1329_v15, %v435_v61 }
  0xa3   : > { %v1330_v43 = vrot.slane %v1093_v52, %v1005_v11  ;;  %v1331_v34 = vrot.slane %v1093_v52, %v1007_v12  ;;  %v1332_v20 = vrot.slane %v1093_v52, %v1009_v13  ;;  %v1333_v22 = vrot.slane %v1093_v52, %v1011_v14 }
  0xa4   : > { %v535_v24 = vadd.f32 %v519_v8, %v413_v53  ;;  %v536_v26 = vadd.f32 %v520_v5, %v414_v54  ;;  %v537_v27 = vadd.f32 %v521_v17, %v415_v55  ;;  %v538_v28 = vadd.f32 %v522_v18, %v416_v56 }
  0xa5   : > { %v531_v25 = vmul.f32 %v1330_v43, %v435_v61  ;;  %v532_v19 = vmul.f32 %v1331_v34, %v435_v61  ;;  %v533_v21 = vmul.f32 %v1332_v20, %v435_v61  ;;  %v534_v23 = vmul.f32 %v1333_v22, %v435_v61 }
  0xa6   : > { %v539_v30 = vadd.f32 %v523_v9, %v417_v35  ;;  %v540_v11 = vadd.f32 %v524_v50, %v418_v36  ;;  %v541_v31 = vadd.f32 %v525_v51, %v419_v37  ;;  %v542_v32 = vadd.f32 %v526_v58, %v420_v38 }
  0xa7   : > { %v543_v33 = vadd.f32 %v527_v60, %v421_v39  ;;  %v544_v12 = vadd.f32 %v528_v0, %v422_v40  ;;  %v545_v1 = vadd.f32 %v529_v4, %v423_v41  ;;  %v546_v48 = vadd.f32 %v530_v16, %v424_v42 }
  0xa8   : > { %v547_v49 = vadd.f32 %v531_v25, %v425_v44  ;;  %v548_v13 = vadd.f32 %v532_v19, %v426_v45  ;;  %v549_v7 = vadd.f32 %v533_v21, %v427_v46  ;;  %v550_v59 = vadd.f32 %v534_v23, %v428_v47 }
  0xa9   : > { %v1163_v57 = vadd.f32 %v555_v29, %v535_v24  ;;  %v1165_v14 = vadd.f32 %v555_v29, %v536_v26  ;;  %v1167_v8 = vadd.f32 %v555_v29, %v537_v27  ;;  %v1169_v52 = vadd.f32 %v555_v29, %v538_v28 }
  0xaa   : > { %v1171_v61 = vadd.f32 %v555_v29, %v539_v30  ;;  %v1173_v5 = vadd.f32 %v555_v29, %v540_v11  ;;  %v1175_v17 = vadd.f32 %v555_v29, %v541_v31  ;;  %v1177_v18 = vadd.f32 %v555_v29, %v542_v32 }
  0xab   : > { %v1179_v53 = vadd.f32 %v555_v29, %v543_v33  ;;  %v1181_v54 = vadd.f32 %v555_v29, %v544_v12  ;;  %v1183_v55 = vadd.f32 %v555_v29, %v545_v1  ;;  %v1185_v56 = vadd.f32 %v555_v29, %v546_v48 }
  0xac   : > { %v1187_v35 = vadd.f32 %v555_v29, %v547_v49  ;;  %v1189_v36 = vadd.f32 %v555_v29, %v548_v13  ;;  %v1191_v37 = vadd.f32 %v555_v29, %v549_v7  ;;  %v1193_v38 = vadd.f32 %v555_v29, %v550_v59 }
  0xad   : > { %v573_v39 = vmax.f32 %v1163_v57, 0.0  ;;  %v574_v40 = vmax.f32 %v1165_v14, 0.0  ;;  %v575_v41 = vmax.f32 %v1167_v8, 0.0  ;;  %v576_v42 = vmax.f32 %v1169_v52, 0.0 }
  0xae   : > { %v577_v44 = vmax.f32 %v1171_v61, 0.0  ;;  %v578_v45 = vmax.f32 %v1173_v5, 0.0  ;;  %v579_v46 = vmax.f32 %v1175_v17, 0.0  ;;  %v580_v47 = vmax.f32 %v1177_v18, 0.0 }
  0xaf   : > { %v581_v9 = vmax.f32 %v1179_v53, 0.0  ;;  %v582_v50 = vmax.f32 %v1181_v54, 0.0  ;;  %v583_v51 = vmax.f32 %v1183_v55, 0.0  ;;  %v584_v58 = vmax.f32 %v1185_v56, 0.0 }
  0xb0   : > { %v585_v10 = vmax.f32 %v1187_v35, 0.0  ;;  %v586_v60 = vmax.f32 %v1189_v36, 0.0  ;;  %v587_v62 = vmax.f32 %v1191_v37, 0.0  ;;  %v588_v63 = vmax.f32 %v1193_v38, 0.0 }
  0xb1   : > { %v589_v0 = vmin.f32 %v573_v39, 6.0  ;;  %v590_v2 = vmin.f32 %v574_v40, 6.0  ;;  %v591_v3 = vmin.f32 %v575_v41, 6.0  ;;  %v592_v4 = vmin.f32 %v576_v42, 6.0 }
  0xb2   : > { %v593_v6 = vmin.f32 %v577_v44, 6.0  ;;  %v594_v15 = vmin.f32 %v578_v45, 6.0  ;;  %v595_v16 = vmin.f32 %v579_v46, 6.0  ;;  %v596_v43 = vmin.f32 %v580_v47, 6.0 }
  0xb3   : > { %v597_v25 = vmin.f32 %v581_v9, 6.0  ;;  %v598_v34 = vmin.f32 %v582_v50, 6.0  ;;  %v599_v19 = vmin.f32 %v583_v51, 6.0  ;;  %v600_v20 = vmin.f32 %v584_v58, 6.0 }
  0xb4   : > { %v601_v21 = vmin.f32 %v585_v10, 6.0  ;;  %v602_v22 = vmin.f32 %v586_v60, 6.0  ;;  %v603_v23 = vmin.f32 %v587_v62, 6.0  ;;  %v604_v24 = vmin.f32 %v588_v63, 6.0 }
  0xb5   : > { %v605_v26 = vmul.f32 4.0, %v589_v0  ;;  %v606_v27 = vmul.f32 4.0, %v590_v2  ;;  %v607_v28 = vmul.f32 4.0, %v591_v3  ;;  %v608_v29 = vmul.f32 4.0, %v592_v4 }
  0xb6   : > { %v609_v30 = vmul.f32 4.0, %v593_v6  ;;  %v610_v11 = vmul.f32 4.0, %v594_v15  ;;  %v611_v31 = vmul.f32 4.0, %v595_v16  ;;  %v612_v32 = vmul.f32 4.0, %v596_v43 }
  0xb7   : > { %v613_v33 = vmul.f32 4.0, %v597_v25  ;;  %v614_v12 = vmul.f32 4.0, %v598_v34  ;;  %v615_v1 = vmul.f32 4.0, %v599_v19  ;;  %v616_v48 = vmul.f32 4.0, %v600_v20 }
  0xb8   : > { %v617_v49 = vmul.f32 4.0, %v601_v21  ;;  %v618_v13 = vmul.f32 4.0, %v602_v22  ;;  %v619_v7 = vmul.f32 4.0, %v603_v23  ;;  %v620_v59 = vmul.f32 4.0, %v604_v24 }
  0xb9   : > { %v621_v39 = vsub.f32 %v1163_v57, %v605_v26  ;;  %v622_v40 = vsub.f32 %v1165_v14, %v606_v27  ;;  %v623_v41 = vsub.f32 %v1167_v8, %v607_v28  ;;  %v624_v42 = vsub.f32 %v1169_v52, %v608_v29 }
  0xba   : > { %v625_v44 = vsub.f32 %v1171_v61, %v609_v30  ;;  %v626_v57 = vsub.f32 %v1173_v5, %v610_v11  ;;  %v627_v14 = vsub.f32 %v1175_v17, %v611_v31  ;;  %v628_v8 = vsub.f32 %v1177_v18, %v612_v32 }
  0xbb   : > { %v629_v52 = vsub.f32 %v1179_v53, %v613_v33  ;;  %v630_v45 = vsub.f32 %v1181_v54, %v614_v12  ;;  %v631_v46 = vsub.f32 %v1183_v55, %v615_v1  ;;  %v632_v47 = vsub.f32 %v1185_v56, %v616_v48  ;;  %637 = vst [vmem:[%s1222_s11] sm:$0xff] %v621_v39 }
  0xbc   : > { %638 = vst [vmem:[%s1222_s11 + $0x8] sm:$0xff] %v622_v40  ;;  %639 = vst [vmem:[%s1222_s11 + $0x10] sm:$0xff] %v623_v41  ;;  %v633_v61 = vsub.f32 %v1187_v35, %v617_v49  ;;  %v634_v5 = vsub.f32 %v1189_v36, %v618_v13  ;;  %v635_v17 = vsub.f32 %v1191_v37, %v619_v7 }
  0xbd   : > { %640 = vst [vmem:[%s1222_s11 + $0x18] sm:$0xff] %v624_v42  ;;  %v636_v18 = vsub.f32 %v1193_v38, %v620_v59  ;;  %641 = vst [vmem:[%s1222_s11 + $0x20] sm:$0xff] %v625_v44 }
  0xbe   : > { %642 = vst [vmem:[%s1222_s11 + $0x28] sm:$0xff] %v626_v57  ;;  %643 = vst [vmem:[%s1222_s11 + $0x30] sm:$0xff] %v627_v14 }
  0xbf   : > { %644 = vst [vmem:[%s1222_s11 + $0x38] sm:$0xff] %v628_v8  ;;  %645 = vst [vmem:[%s1222_s11 + $0x40] sm:$0xff] %v629_v52 }
  0xc0   : > { %646 = vst [vmem:[%s1222_s11 + $0x48] sm:$0xff] %v630_v45  ;;  %647 = vst [vmem:[%s1222_s11 + $0x50] sm:$0xff] %v631_v46 }
  0xc1   : > { %648 = vst [vmem:[%s1222_s11 + $0x58] sm:$0xff] %v632_v47  ;;  %649 = vst [vmem:[%s1222_s11 + $0x60] sm:$0xff] %v633_v61 }
  0xc2   : > { %650 = vst [vmem:[%s1222_s11 + $0x68] sm:$0xff] %v634_v5  ;;  %651 = vst [vmem:[%s1222_s11 + $0x70] sm:$0xff] %v635_v17 }
  0xc3   : > { %652 = vst [vmem:[%s1222_s11 + $0x78] sm:$0xff] %v636_v18 }
  0xc4   : > { %841 = shalt.err (!%p838_p5)
}
  0xc5   : > { %s842_s30 = scalar_lea.hbm %s1248_s21, 2048  ;;  %s846_s6 = scalar_lea.hbm %s1307_s3, 4096 }
  0xc6   : > { %p843_p6 = scmp.ne.s32.totalorder %s1248_s21, %s842_s30  ;;  %p847_p10 = scmp.lt.s32.totalorder %s1248_s21, %s1307_s3 }
  0xc7   : > { %p848_p11 = scmp.lt.s32.totalorder %s846_s6, %s842_s30 }
  0xc8   : > { %p844_p7 = pnand %p843_p6, %p970_p4 }
  0xc9   : > { %p849_p12 = por %p848_p11, %p847_p10 }
  0xca   : > { %p845_p9 = pneg %p844_p7 }
  0xcc   : > { %p850_p13 = pnand %p849_p12, %p845_p9 }
  0xce   : > { %853 = shalt.err (!%p850_p13)
}
  0xcf   : > { %765 = dma.vmem_to_hbm [thread:$0]  (%p970_p4), %s1250_s18, 2048, %s1248_s21, %s654_s23  }
  0xd0 PF: > { %p771_p0 = scmp.ge.s32.totalorder %s904_s17, 2  ;;  %s682_s9 = sand.u32 1, %s884_s12  }
  0xd1   : > { %s683_s10 = scalar_lea.sflag [#allocation3], %s682_s9 }
  0xd2   : > { %p768_p1 = pnand %p771_p0, %p977_p8 }
  0xd4   : > { %p769_p2 = pneg %p768_p1 }
  0xd6   : > { %879 = dma.done.wait (%p769_p2), %s683_s10, 2048  }
  0xd7   : > { %881 = vsyncadd (%p769_p2), %s683_s10, 4294965248  ;;  %s16_s17 = sadd.s32 1, %s904_s17   ;;  %s1334_s12 = smov %s888_s13 }
  0xd8   : > { %p13_p3 = scmp.ge.s32.totalorder %s16_s17, 4   ;;  %s1335_s13 = smov %s892_s14 }
  0xd9   : > { %s1336_s14 = smov %s983_s25  ;;  %s1337_s15 = smov %s900_s16 }
  0xda   : > { %s1338_s16 = smov %s1340_s20  ;;  %15 = sbr.rel (!%p13_p3) target bundleno = 4 (0x4), region = 72 }
  0xdf   :  { %688 = vsyncpa [#allocation3], 1 }
  0xe0   :  { %690 = vsyncpa [#allocation3 + $0x1], 1 }

</bundles_post_ra>
